<compile_context>
chip_gen: v5e
topology: v5e:2x2
jax: 0.10.0
libtpu: 0.0.40
codegen_flags: <defaults>
</compile_context>

<pallas_src>
import jax
import jax.numpy as jnp
from jax.experimental import pallas as pl
from jax.experimental.pallas import tpu as pltpu


def _skip_kernel(x_ref, s_ref, w_ref, o_ref):
    """out[:, o, :] = sum_c w[o, c] * x[:, c, :] + skip[:, o, :].

    x_ref, s_ref, o_ref: (bn, C, t_hw) VMEM tiles (spatial on the lane axis).
    w_ref:               (C*C,) float32 weights in SMEM, row-major (o, c).
    """
    C = o_ref.shape[1]
    for o in range(C):                       # unrolled: C is a small static int
        acc = s_ref[:, o, :].astype(jnp.float32)
        for c in range(C):
            acc = acc + w_ref[o * C + c] * x_ref[:, c, :].astype(jnp.float32)
        o_ref[:, o, :] = acc.astype(o_ref.dtype)


def _largest_tile(dim, quantum, max_elems):
    """Largest divisor of `dim` that is a multiple of `quantum` and <= max_elems.

    Falls back to the full `dim`, which is always a legal Pallas block size.
    """
    if dim <= max_elems or dim % quantum != 0:
        return dim
    best = quantum
    t = quantum
    while t <= max_elems:
        if dim % t == 0:
            best = t
        t += quantum
    return best


def _largest_batch_group(n, cap):
    """Largest divisor of n that is <= cap (at least 1)."""
    for cand in range(max(1, min(n, cap)), 0, -1):
        if n % cand == 0:
            return cand
    return 1


def skip_forward(x_nchw, skip_nchw, weight, *, target_block_bytes=2 * 1024 * 1024):
    """Pallas implementation of Skip.forward.

    Args:
      x_nchw:    (N, C, H, W) input.
      skip_nchw: (N, C, H, W) skip tensor.
      weight:    (C_out, C_in, 1, 1) conv weight (no bias), C_out == C_in == C.
    Returns:
      (x_nchw, conv(x) + skip), both NCHW, matching the PyTorch module.
    """
    N, C, H, W = x_nchw.shape
    assert skip_nchw.shape == x_nchw.shape
    assert weight.shape == (C, C, 1, 1)
    HW = H * W

    # Free views (no HBM data movement): NCHW -> (N, C, H*W).
    x3 = x_nchw.reshape(N, C, HW)
    s3 = skip_nchw.reshape(N, C, HW)
    # (C_out, C_in, 1, 1) -> flat (C_out*C_in,) f32 scalars, row-major (o, c).
    w_flat = weight.reshape(C, C).astype(jnp.float32).reshape(C * C)

    itemsize = x_nchw.dtype.itemsize
    # Lane tile: large multiple of 128 dividing H*W (or the full H*W).
    t_hw = _largest_tile(HW, 128, max(128, target_block_bytes // (C * itemsize)))
    # Group batch images per block until we reach ~target_block_bytes.
    bn_cap = max(1, target_block_bytes // (C * t_hw * itemsize))
    bn = _largest_batch_group(N, bn_cap)

    grid = (N // bn, HW // t_hw)
    blk = (bn, C, t_hw)  # last two dims: C == full dim, t_hw multiple of 128 / full

    out3 = pl.pallas_call(
        _skip_kernel,
        out_shape=jax.ShapeDtypeStruct((N, C, HW), x3.dtype),
        grid_spec=pltpu.PrefetchScalarGridSpec(
            num_scalar_prefetch=0,
            grid=grid,
            in_specs=[
                pl.BlockSpec(blk, lambda i, j: (i, 0, j)),          # x tile
                pl.BlockSpec(blk, lambda i, j: (i, 0, j)),          # skip tile
                pl.BlockSpec(memory_space=pltpu.MemorySpace.SMEM),  # weights
            ],
            out_specs=pl.BlockSpec(blk, lambda i, j: (i, 0, j)),
        ),
        compiler_params=pltpu.CompilerParams(
            dimension_semantics=("parallel", "parallel"),
            vmem_limit_bytes=32 * 1024 * 1024,
        ),
    )(x3, s3, w_flat)

    out = out3.reshape(N, C, H, W)
    # The PyTorch module returns the input tensor itself as the first element.
    return x_nchw, out


if __name__ == "__main__":
    key = jax.random.PRNGKey(0)
    k_x, k_s, k_w = jax.random.split(key, 3)

    N, C, H, W = 2, 4, 16, 16  # l = 4 channels
    x = jax.random.normal(k_x, (N, C, H, W), dtype=jnp.float32)
    skip = jax.random.normal(k_s, (N, C, H, W), dtype=jnp.float32)
    # Deterministic conv weight, Conv2d(l, l, 1, bias=False) -> (C, C, 1, 1)
    weight = (jax.random.normal(k_w, (C, C, 1, 1), dtype=jnp.float32)
              * (1.0 / jnp.sqrt(C)))

    x_out, y_out = skip_forward(x, skip, weight)
    jax.block_until_ready((x_out, y_out))

    # Reference check in plain JAX (1x1 conv == channel matmul).
    ref = jnp.einsum("oc,nchw->nohw", weight[:, :, 0, 0], x) + skip
    assert x_out.shape == x.shape and jnp.allclose(x_out, x)
    assert jnp.allclose(y_out, ref, atol=1e-5, rtol=1e-5)

    print("KERNEL_OK")
</pallas_src>

<mosaic_0001>
module attributes {stable_mosaic.version = 11 : i64} {
  func.func @_skip_kernel(%arg0: i32, %arg1: i32, %arg2: memref<2x4x256xf32, #tpu.memory_space<vmem>>, %arg3: memref<2x4x256xf32, #tpu.memory_space<vmem>>, %arg4: memref<16xf32, #tpu.memory_space<smem>>, %arg5: memref<2x4x256xf32, #tpu.memory_space<vmem>>) attributes {dimension_semantics = [#tpu.dimension_semantics<parallel>, #tpu.dimension_semantics<parallel>], iteration_bounds = array<i64: 1, 1>, scalar_prefetch = 0 : i64, scratch_operands = 0 : i64, tpu.core_type = #tpu.core_type<tc>, window_params = [{transform_indices = @transform_0, window_bounds = array<i64: 2, 4, 256>}, {transform_indices = @transform_1, window_bounds = array<i64: 2, 4, 256>}, {transform_indices = @transform_2, window_bounds = array<i64: 16>}, {transform_indices = @transform_3, window_bounds = array<i64: 2, 4, 256>}]} {
    %c0 = arith.constant 0 : index
    %c0_0 = arith.constant 0 : index
    %c0_1 = arith.constant 0 : index
    %0 = vector.load %arg3[%c0, %c0_0, %c0_1] : memref<2x4x256xf32, #tpu.memory_space<vmem>>, vector<2x1x256xf32>
    %1 = vector.shape_cast %0 : vector<2x1x256xf32> to vector<2x256xf32>
    %c0_2 = arith.constant 0 : index
    %2 = memref.load %arg4[%c0_2] : memref<16xf32, #tpu.memory_space<smem>>
    %c0_3 = arith.constant 0 : index
    %c0_4 = arith.constant 0 : index
    %c0_5 = arith.constant 0 : index
    %3 = vector.load %arg2[%c0_3, %c0_4, %c0_5] : memref<2x4x256xf32, #tpu.memory_space<vmem>>, vector<2x1x256xf32>
    %4 = vector.shape_cast %3 : vector<2x1x256xf32> to vector<2x256xf32>
    %5 = vector.broadcast %2 : f32 to vector<2x256xf32>
    %6 = arith.mulf %5, %4 : vector<2x256xf32>
    %7 = arith.addf %1, %6 : vector<2x256xf32>
    %c1 = arith.constant 1 : index
    %8 = memref.load %arg4[%c1] : memref<16xf32, #tpu.memory_space<smem>>
    %c0_6 = arith.constant 0 : index
    %c1_7 = arith.constant 1 : index
    %c0_8 = arith.constant 0 : index
    %9 = vector.load %arg2[%c0_6, %c1_7, %c0_8] : memref<2x4x256xf32, #tpu.memory_space<vmem>>, vector<2x1x256xf32>
    %10 = vector.shape_cast %9 : vector<2x1x256xf32> to vector<2x256xf32>
    %11 = vector.broadcast %8 : f32 to vector<2x256xf32>
    %12 = arith.mulf %11, %10 : vector<2x256xf32>
    %13 = arith.addf %7, %12 : vector<2x256xf32>
    %c2 = arith.constant 2 : index
    %14 = memref.load %arg4[%c2] : memref<16xf32, #tpu.memory_space<smem>>
    %c0_9 = arith.constant 0 : index
    %c2_10 = arith.constant 2 : index
    %c0_11 = arith.constant 0 : index
    %15 = vector.load %arg2[%c0_9, %c2_10, %c0_11] : memref<2x4x256xf32, #tpu.memory_space<vmem>>, vector<2x1x256xf32>
    %16 = vector.shape_cast %15 : vector<2x1x256xf32> to vector<2x256xf32>
    %17 = vector.broadcast %14 : f32 to vector<2x256xf32>
    %18 = arith.mulf %17, %16 : vector<2x256xf32>
    %19 = arith.addf %13, %18 : vector<2x256xf32>
    %c3 = arith.constant 3 : index
    %20 = memref.load %arg4[%c3] : memref<16xf32, #tpu.memory_space<smem>>
    %c0_12 = arith.constant 0 : index
    %c3_13 = arith.constant 3 : index
    %c0_14 = arith.constant 0 : index
    %21 = vector.load %arg2[%c0_12, %c3_13, %c0_14] : memref<2x4x256xf32, #tpu.memory_space<vmem>>, vector<2x1x256xf32>
    %22 = vector.shape_cast %21 : vector<2x1x256xf32> to vector<2x256xf32>
    %23 = vector.broadcast %20 : f32 to vector<2x256xf32>
    %24 = arith.mulf %23, %22 : vector<2x256xf32>
    %25 = arith.addf %19, %24 : vector<2x256xf32>
    %c0_15 = arith.constant 0 : index
    %c0_16 = arith.constant 0 : index
    %c0_17 = arith.constant 0 : index
    %26 = vector.load %arg5[%c0_15, %c0_16, %c0_17] : memref<2x4x256xf32, #tpu.memory_space<vmem>>, vector<2x1x256xf32>
    %27 = vector.shape_cast %26 : vector<2x1x256xf32> to vector<2x256xf32>
    %28 = vector.shape_cast %25 : vector<2x256xf32> to vector<2x1x256xf32>
    tpu.vector_store %arg5[%c0_15, %c0_16, %c0_17], %28 {strides = array<i32>} : memref<2x4x256xf32, #tpu.memory_space<vmem>>, vector<2x1x256xf32>,
    %c0_18 = arith.constant 0 : index
    %c1_19 = arith.constant 1 : index
    %c0_20 = arith.constant 0 : index
    %29 = vector.load %arg3[%c0_18, %c1_19, %c0_20] : memref<2x4x256xf32, #tpu.memory_space<vmem>>, vector<2x1x256xf32>
    %30 = vector.shape_cast %29 : vector<2x1x256xf32> to vector<2x256xf32>
    %c4 = arith.constant 4 : index
    %31 = memref.load %arg4[%c4] : memref<16xf32, #tpu.memory_space<smem>>
    %c0_21 = arith.constant 0 : index
    %c0_22 = arith.constant 0 : index
    %c0_23 = arith.constant 0 : index
    %32 = vector.load %arg2[%c0_21, %c0_22, %c0_23] : memref<2x4x256xf32, #tpu.memory_space<vmem>>, vector<2x1x256xf32>
    %33 = vector.shape_cast %32 : vector<2x1x256xf32> to vector<2x256xf32>
    %34 = vector.broadcast %31 : f32 to vector<2x256xf32>
    %35 = arith.mulf %34, %33 : vector<2x256xf32>
    %36 = arith.addf %30, %35 : vector<2x256xf32>
    %c5 = arith.constant 5 : index
    %37 = memref.load %arg4[%c5] : memref<16xf32, #tpu.memory_space<smem>>
    %c0_24 = arith.constant 0 : index
    %c1_25 = arith.constant 1 : index
    %c0_26 = arith.constant 0 : index
    %38 = vector.load %arg2[%c0_24, %c1_25, %c0_26] : memref<2x4x256xf32, #tpu.memory_space<vmem>>, vector<2x1x256xf32>
    %39 = vector.shape_cast %38 : vector<2x1x256xf32> to vector<2x256xf32>
    %40 = vector.broadcast %37 : f32 to vector<2x256xf32>
    %41 = arith.mulf %40, %39 : vector<2x256xf32>
    %42 = arith.addf %36, %41 : vector<2x256xf32>
    %c6 = arith.constant 6 : index
    %43 = memref.load %arg4[%c6] : memref<16xf32, #tpu.memory_space<smem>>
    %c0_27 = arith.constant 0 : index
    %c2_28 = arith.constant 2 : index
    %c0_29 = arith.constant 0 : index
    %44 = vector.load %arg2[%c0_27, %c2_28, %c0_29] : memref<2x4x256xf32, #tpu.memory_space<vmem>>, vector<2x1x256xf32>
    %45 = vector.shape_cast %44 : vector<2x1x256xf32> to vector<2x256xf32>
    %46 = vector.broadcast %43 : f32 to vector<2x256xf32>
    %47 = arith.mulf %46, %45 : vector<2x256xf32>
    %48 = arith.addf %42, %47 : vector<2x256xf32>
    %c7 = arith.constant 7 : index
    %49 = memref.load %arg4[%c7] : memref<16xf32, #tpu.memory_space<smem>>
    %c0_30 = arith.constant 0 : index
    %c3_31 = arith.constant 3 : index
    %c0_32 = arith.constant 0 : index
    %50 = vector.load %arg2[%c0_30, %c3_31, %c0_32] : memref<2x4x256xf32, #tpu.memory_space<vmem>>, vector<2x1x256xf32>
    %51 = vector.shape_cast %50 : vector<2x1x256xf32> to vector<2x256xf32>
    %52 = vector.broadcast %49 : f32 to vector<2x256xf32>
    %53 = arith.mulf %52, %51 : vector<2x256xf32>
    %54 = arith.addf %48, %53 : vector<2x256xf32>
    %c0_33 = arith.constant 0 : index
    %c1_34 = arith.constant 1 : index
    %c0_35 = arith.constant 0 : index
    %55 = vector.load %arg5[%c0_33, %c1_34, %c0_35] : memref<2x4x256xf32, #tpu.memory_space<vmem>>, vector<2x1x256xf32>
    %56 = vector.shape_cast %55 : vector<2x1x256xf32> to vector<2x256xf32>
    %57 = vector.shape_cast %54 : vector<2x256xf32> to vector<2x1x256xf32>
    tpu.vector_store %arg5[%c0_33, %c1_34, %c0_35], %57 {strides = array<i32>} : memref<2x4x256xf32, #tpu.memory_space<vmem>>, vector<2x1x256xf32>,
    %c0_36 = arith.constant 0 : index
    %c2_37 = arith.constant 2 : index
    %c0_38 = arith.constant 0 : index
    %58 = vector.load %arg3[%c0_36, %c2_37, %c0_38] : memref<2x4x256xf32, #tpu.memory_space<vmem>>, vector<2x1x256xf32>
    %59 = vector.shape_cast %58 : vector<2x1x256xf32> to vector<2x256xf32>
    %c8 = arith.constant 8 : index
    %60 = memref.load %arg4[%c8] : memref<16xf32, #tpu.memory_space<smem>>
    %c0_39 = arith.constant 0 : index
    %c0_40 = arith.constant 0 : index
    %c0_41 = arith.constant 0 : index
    %61 = vector.load %arg2[%c0_39, %c0_40, %c0_41] : memref<2x4x256xf32, #tpu.memory_space<vmem>>, vector<2x1x256xf32>
    %62 = vector.shape_cast %61 : vector<2x1x256xf32> to vector<2x256xf32>
    %63 = vector.broadcast %60 : f32 to vector<2x256xf32>
    %64 = arith.mulf %63, %62 : vector<2x256xf32>
    %65 = arith.addf %59, %64 : vector<2x256xf32>
    %c9 = arith.constant 9 : index
    %66 = memref.load %arg4[%c9] : memref<16xf32, #tpu.memory_space<smem>>
    %c0_42 = arith.constant 0 : index
    %c1_43 = arith.constant 1 : index
    %c0_44 = arith.constant 0 : index
    %67 = vector.load %arg2[%c0_42, %c1_43, %c0_44] : memref<2x4x256xf32, #tpu.memory_space<vmem>>, vector<2x1x256xf32>
    %68 = vector.shape_cast %67 : vector<2x1x256xf32> to vector<2x256xf32>
    %69 = vector.broadcast %66 : f32 to vector<2x256xf32>
    %70 = arith.mulf %69, %68 : vector<2x256xf32>
    %71 = arith.addf %65, %70 : vector<2x256xf32>
    %c10 = arith.constant 10 : index
    %72 = memref.load %arg4[%c10] : memref<16xf32, #tpu.memory_space<smem>>
    %c0_45 = arith.constant 0 : index
    %c2_46 = arith.constant 2 : index
    %c0_47 = arith.constant 0 : index
    %73 = vector.load %arg2[%c0_45, %c2_46, %c0_47] : memref<2x4x256xf32, #tpu.memory_space<vmem>>, vector<2x1x256xf32>
    %74 = vector.shape_cast %73 : vector<2x1x256xf32> to vector<2x256xf32>
    %75 = vector.broadcast %72 : f32 to vector<2x256xf32>
    %76 = arith.mulf %75, %74 : vector<2x256xf32>
    %77 = arith.addf %71, %76 : vector<2x256xf32>
    %c11 = arith.constant 11 : index
    %78 = memref.load %arg4[%c11] : memref<16xf32, #tpu.memory_space<smem>>
    %c0_48 = arith.constant 0 : index
    %c3_49 = arith.constant 3 : index
    %c0_50 = arith.constant 0 : index
    %79 = vector.load %arg2[%c0_48, %c3_49, %c0_50] : memref<2x4x256xf32, #tpu.memory_space<vmem>>, vector<2x1x256xf32>
    %80 = vector.shape_cast %79 : vector<2x1x256xf32> to vector<2x256xf32>
    %81 = vector.broadcast %78 : f32 to vector<2x256xf32>
    %82 = arith.mulf %81, %80 : vector<2x256xf32>
    %83 = arith.addf %77, %82 : vector<2x256xf32>
    %c0_51 = arith.constant 0 : index
    %c2_52 = arith.constant 2 : index
    %c0_53 = arith.constant 0 : index
    %84 = vector.load %arg5[%c0_51, %c2_52, %c0_53] : memref<2x4x256xf32, #tpu.memory_space<vmem>>, vector<2x1x256xf32>
    %85 = vector.shape_cast %84 : vector<2x1x256xf32> to vector<2x256xf32>
    %86 = vector.shape_cast %83 : vector<2x256xf32> to vector<2x1x256xf32>
    tpu.vector_store %arg5[%c0_51, %c2_52, %c0_53], %86 {strides = array<i32>} : memref<2x4x256xf32, #tpu.memory_space<vmem>>, vector<2x1x256xf32>,
    %c0_54 = arith.constant 0 : index
    %c3_55 = arith.constant 3 : index
    %c0_56 = arith.constant 0 : index
    %87 = vector.load %arg3[%c0_54, %c3_55, %c0_56] : memref<2x4x256xf32, #tpu.memory_space<vmem>>, vector<2x1x256xf32>
    %88 = vector.shape_cast %87 : vector<2x1x256xf32> to vector<2x256xf32>
    %c12 = arith.constant 12 : index
    %89 = memref.load %arg4[%c12] : memref<16xf32, #tpu.memory_space<smem>>
    %c0_57 = arith.constant 0 : index
    %c0_58 = arith.constant 0 : index
    %c0_59 = arith.constant 0 : index
    %90 = vector.load %arg2[%c0_57, %c0_58, %c0_59] : memref<2x4x256xf32, #tpu.memory_space<vmem>>, vector<2x1x256xf32>
    %91 = vector.shape_cast %90 : vector<2x1x256xf32> to vector<2x256xf32>
    %92 = vector.broadcast %89 : f32 to vector<2x256xf32>
    %93 = arith.mulf %92, %91 : vector<2x256xf32>
    %94 = arith.addf %88, %93 : vector<2x256xf32>
    %c13 = arith.constant 13 : index
    %95 = memref.load %arg4[%c13] : memref<16xf32, #tpu.memory_space<smem>>
    %c0_60 = arith.constant 0 : index
    %c1_61 = arith.constant 1 : index
    %c0_62 = arith.constant 0 : index
    %96 = vector.load %arg2[%c0_60, %c1_61, %c0_62] : memref<2x4x256xf32, #tpu.memory_space<vmem>>, vector<2x1x256xf32>
    %97 = vector.shape_cast %96 : vector<2x1x256xf32> to vector<2x256xf32>
    %98 = vector.broadcast %95 : f32 to vector<2x256xf32>
    %99 = arith.mulf %98, %97 : vector<2x256xf32>
    %100 = arith.addf %94, %99 : vector<2x256xf32>
    %c14 = arith.constant 14 : index
    %101 = memref.load %arg4[%c14] : memref<16xf32, #tpu.memory_space<smem>>
    %c0_63 = arith.constant 0 : index
    %c2_64 = arith.constant 2 : index
    %c0_65 = arith.constant 0 : index
    %102 = vector.load %arg2[%c0_63, %c2_64, %c0_65] : memref<2x4x256xf32, #tpu.memory_space<vmem>>, vector<2x1x256xf32>
    %103 = vector.shape_cast %102 : vector<2x1x256xf32> to vector<2x256xf32>
    %104 = vector.broadcast %101 : f32 to vector<2x256xf32>
    %105 = arith.mulf %104, %103 : vector<2x256xf32>
    %106 = arith.addf %100, %105 : vector<2x256xf32>
    %c15 = arith.constant 15 : index
    %107 = memref.load %arg4[%c15] : memref<16xf32, #tpu.memory_space<smem>>
    %c0_66 = arith.constant 0 : index
    %c3_67 = arith.constant 3 : index
    %c0_68 = arith.constant 0 : index
    %108 = vector.load %arg2[%c0_66, %c3_67, %c0_68] : memref<2x4x256xf32, #tpu.memory_space<vmem>>, vector<2x1x256xf32>
    %109 = vector.shape_cast %108 : vector<2x1x256xf32> to vector<2x256xf32>
    %110 = vector.broadcast %107 : f32 to vector<2x256xf32>
    %111 = arith.mulf %110, %109 : vector<2x256xf32>
    %112 = arith.addf %106, %111 : vector<2x256xf32>
    %c0_69 = arith.constant 0 : index
    %c3_70 = arith.constant 3 : index
    %c0_71 = arith.constant 0 : index
    %113 = vector.load %arg5[%c0_69, %c3_70, %c0_71] : memref<2x4x256xf32, #tpu.memory_space<vmem>>, vector<2x1x256xf32>
    %114 = vector.shape_cast %113 : vector<2x1x256xf32> to vector<2x256xf32>
    %115 = vector.shape_cast %112 : vector<2x256xf32> to vector<2x1x256xf32>
    tpu.vector_store %arg5[%c0_69, %c3_70, %c0_71], %115 {strides = array<i32>} : memref<2x4x256xf32, #tpu.memory_space<vmem>>, vector<2x1x256xf32>,
    return
  }
  func.func @transform_0(%arg0: i32, %arg1: i32) -> (i32, i32, i32) {
    %c0_i32 = arith.constant 0 : i32
    %c0_i32_0 = arith.constant 0 : i32
    return %arg0, %c0_i32, %arg1 : i32, i32, i32
  }
  func.func @transform_1(%arg0: i32, %arg1: i32) -> (i32, i32, i32) {
    %c0_i32 = arith.constant 0 : i32
    %c0_i32_0 = arith.constant 0 : i32
    return %arg0, %c0_i32, %arg1 : i32, i32, i32
  }
  func.func @transform_2(%arg0: i32, %arg1: i32) -> i32 {
    %c0_i32 = arith.constant 0 : i32
    %c0_i32_0 = arith.constant 0 : i32
    return %c0_i32 : i32
  }
  func.func @transform_3(%arg0: i32, %arg1: i32) -> (i32, i32, i32) {
    %c0_i32 = arith.constant 0 : i32
    %c0_i32_0 = arith.constant 0 : i32
    return %arg0, %c0_i32, %arg1 : i32, i32, i32
  }
}

</mosaic_0001>

<bundles_post_ra>
// kernel: tpu_custom_call.1
= control target key start
LH: loop header
LB: loop body
LE: loop exit
PB: predicated region body
PF: predicated region fallthrough
CT: control target
= control target key end

     0   :  { %8 = vsyncpa [#allocation3], 0  ;;  %s457_s0 = inlined_call_operand.hbm [shape: f32[2,4,256], index: 0, kind: input, shape index: {}]   ;;  %s458_s1 = inlined_call_operand.hbm [shape: f32[2,4,256], index: 1, kind: input, shape index: {}]   ;;  %s459_s2 = inlined_call_operand.vmem [shape: f32[16], index: 2, kind: input, shape index: {}]   ;;  %s460_s3 = inlined_call_operand.hbm [shape: f32[2,4,256], index: 3, kind: output, shape index: {}]  }
   0x1   :  { %9 = vsyncpa [#allocation7], 0 }
   0x2   :  { %10 = vsyncpa [#allocation5], 0 }
   0x3   :  { %11 = vsyncpa [#allocation4], 0  ;;  %s16_s14 = sshll.u32 %s457_s0, 4  ;;  %s363_s15 = smov [#allocation2]   ;;  %s17_s14 = int_to_ptr.hbm [resolvable:$true] %s16_s14 }
   0x4   :  { %s18_s16 = sshll.u32 %s363_s15, 4  ;;  %s29_s19 = sshll.u32 %s458_s1, 4  ;;  %s19_s16 = int_to_ptr.vmem [resolvable:$true] %s18_s16  ;;  %s30_s19 = int_to_ptr.hbm [resolvable:$true] %s29_s19 }
   0x5   :  { %s364_s20 = smov 128   ;;  %s365_s21 = smov 8  }
   0x6   :  { %24 = dma.hbm_to_vmem [thread:$0]  %s17_s14, 256, %s19_s16, [#allocation3], %s364_s20, %s364_s20, %s365_s21  }
   0x7   :  { %s366_s22 = smov [#allocation6]   ;;  %s43_s0 = sshll.u32 %s459_s2, 4  ;;  %s44_s0 = int_to_ptr.vmem [resolvable:$true] %s43_s0 }
   0x8   :  { %s31_s23 = sshll.u32 %s366_s22, 4  ;;  %s367_s1 = smov [#allocation8]   ;;  %s32_s23 = int_to_ptr.vmem [resolvable:$true] %s31_s23 }
   0x9   :  { %37 = dma.hbm_to_vmem [thread:$0]  %s30_s19, 256, %s32_s23, [#allocation7], %s364_s20, %s364_s20, %s365_s21  }
   0xa   :  { %46 = dma.vmem_to_smem %s44_s0, 16, %s367_s1, [#allocation5]  }
   0xb   :  { %355 = dma.done.wait [#allocation3], 256  }
   0xc   :  { %356 = vsyncadd [#allocation3], 4294967040 }
   0xd   :  { %357 = dma.done.wait [#allocation7], 256  }
   0xe   :  { %358 = vsyncadd [#allocation7], 4294967040 }
   0xf   :  { %359 = dma.done.wait [#allocation5], 16  }
  0x10   :  { %360 = vsyncadd [#allocation5], 4294967280 }
  0x11   :  { %59 = sfence }
  0x12   :  { %s63_s26 = sld [smem:[#allocation8]]  ;;  %v64_v0 = vld [vmem:[#allocation2] ss:$4 sm:$0x3]  ;;  %v102_v21 = vlaneseq  ;;  %s368_s14 = smov [#allocation9]  }
  0x13   :  { %s250_s27 = sld [smem:[#allocation8 + $0x1]]  ;;  %v60_v1 = vld [vmem:[#allocation6] ss:$4 sm:$0x3]  ;;  %s233_s15 = sshll.u32 %s368_s14, 4  ;;  %s234_s15 = int_to_ptr.vmem [resolvable:$true] %s233_s15 }
  0x14   :  { %s251_s28 = sld [smem:[#allocation8 + $0x2]]  ;;  %v74_v2 = vld [vmem:[#allocation2 + $0x1] ss:$4 sm:$0x3]  ;;  %vm413_vm0 = vcmp.lt.s32.totalorder %v102_v21, 256  ;;  %s235_s18 = sshll.u32 %s460_s3, 4  ;;  %s236_s18 = int_to_ptr.hbm [resolvable:$true] %s235_s18 }
  0x15   :  { %s252_s2 = sld [smem:[#allocation8 + $0x3]]  ;;  %v84_v3 = vld [vmem:[#allocation2 + $0x2] ss:$4 sm:$0x3] }
  0x16   :  { %v66_v4 = vld [vmem:[#allocation2 + $0x8] ss:$4 sm:$0x3]  ;;  %v76_v5 = vld [vmem:[#allocation2 + $0x9] ss:$4 sm:$0x3] }
  0x17   :  { %v94_v7 = vld [vmem:[#allocation2 + $0x3] ss:$4 sm:$0x3]  ;;  %v62_v8 = vld [vmem:[#allocation6 + $0x8] ss:$4 sm:$0x3] }
  0x18   :  { %v67_v6 = vstv %s63_s26  ;;  %v86_v12 = vld [vmem:[#allocation2 + $0xa] ss:$4 sm:$0x3]  ;;  %s404_s29 = sld [smem:[#allocation8 + $0x4]] }
  0x19   :  { %v68_v9 = vmul.f32 %v67_v6, %v64_v0  ;;  %v77_v10 = vstv %s250_s27  ;;  %v69_v11 = vmul.f32 %v67_v6, %v66_v4  ;;  %v96_v16 = vld [vmem:[#allocation2 + $0xb] ss:$4 sm:$0x3]  ;;  %s406_s30 = sld [smem:[#allocation8 + $0x5]] }
  0x1a   :  { %v78_v13 = vmul.f32 %v77_v10, %v74_v2  ;;  %v87_v14 = vstv %s251_s28  ;;  %v79_v15 = vmul.f32 %v77_v10, %v76_v5  ;;  %s408_s4 = sld [smem:[#allocation8 + $0x6]]  ;;  %v110_v27 = vld [vmem:[#allocation6 + $0x1] ss:$4 sm:$0x3] }
  0x1b   :  { %v70_v17 = vadd.f32 %v68_v9, %v60_v1  ;;  %v88_v18 = vmul.f32 %v87_v14, %v84_v3  ;;  %v97_v19 = vstv %s252_s2  ;;  %v71_v20 = vadd.f32 %v69_v11, %v62_v8  ;;  %s410_s5 = sld [smem:[#allocation8 + $0x7]]  ;;  %v114_v28 = vld [vmem:[#allocation2] ss:$4 sm:$0x3] }
  0x1c   :  { %v89_v22 = vmul.f32 %v87_v14, %v86_v12  ;;  %v98_v24 = vmul.f32 %v97_v19, %v94_v7  ;;  %v99_v26 = vmul.f32 %v97_v19, %v96_v16  ;;  %v122_v29 = vld [vmem:[#allocation2 + $0x1] ss:$4 sm:$0x3]  ;;  %v130_v30 = vld [vmem:[#allocation2 + $0x2] ss:$4 sm:$0x3] }
  0x1d   :  { %v80_v23 = vadd.f32 %v78_v13, %v70_v17  ;;  %v81_v25 = vadd.f32 %v79_v15, %v71_v20  ;;  %v115_v31 = vld [vmem:[#allocation2 + $0x8] ss:$4 sm:$0x3]  ;;  %v138_v35 = vld [vmem:[#allocation2 + $0x3] ss:$4 sm:$0x3] }
  0x1e   :  { %v116_v34 = vstv %s404_s29  ;;  %v112_v36 = vld [vmem:[#allocation6 + $0x9] ss:$4 sm:$0x3]  ;;  %v123_v37 = vld [vmem:[#allocation2 + $0x9] ss:$4 sm:$0x3] }
  0x1f   :  { %v90_v32 = vadd.f32 %v88_v18, %v80_v23  ;;  %v91_v33 = vadd.f32 %v89_v22, %v81_v25  ;;  %v117_v39 = vmul.f32 %v116_v34, %v114_v28  ;;  %v124_v40 = vstv %s406_s30  ;;  %v131_v42 = vld [vmem:[#allocation2 + $0xa] ss:$4 sm:$0x3]  ;;  %s418_s6 = sld [smem:[#allocation8 + $0x8]] }
  0x20   :  { %v118_v41 = vmul.f32 %v116_v34, %v115_v31  ;;  %v125_v45 = vmul.f32 %v124_v40, %v122_v29  ;;  %v132_v46 = vstv %s408_s4  ;;  %v139_v47 = vld [vmem:[#allocation2 + $0xb] ss:$4 sm:$0x3]  ;;  %s421_s7 = sld [smem:[#allocation8 + $0x9]]  ;;  %v126_v53 = vmul.f32 %v124_v40, %v123_v37 }
  0x21   :  { %v100_v43 = vadd.f32 %v98_v24, %v90_v32  ;;  %v101_v44 = vadd.f32 %v99_v26, %v91_v33  ;;  %v119_v48 = vadd.f32 %v117_v39, %v110_v27  ;;  %v133_v49 = vmul.f32 %v132_v46, %v130_v30  ;;  %v154_v52 = vld [vmem:[#allocation2] ss:$4 sm:$0x3]  ;;  %s424_s8 = sld [smem:[#allocation8 + $0xa]] }
  0x22   :  { %v140_v50 = vstv %s410_s5  ;;  %v120_v51 = vadd.f32 %v118_v41, %v112_v36  ;;  %v134_v54 = vmul.f32 %v132_v46, %v131_v42  ;;  %v162_v55 = vld [vmem:[#allocation2 + $0x1] ss:$4 sm:$0x3]  ;;  %v150_v58 = vld [vmem:[#allocation6 + $0x2] ss:$4 sm:$0x3] }
  0x23   :  { %106 = vst.msk [vmem:[#allocation9] ss:$4 sm:$0x3] %vm413_vm0, %v100_v43  ;;  %v127_v56 = vadd.f32 %v125_v45, %v119_v48  ;;  %v141_v57 = vmul.f32 %v140_v50, %v138_v35  ;;  %s430_s9 = sld [smem:[#allocation8 + $0xb]]  ;;  %v142_v60 = vmul.f32 %v140_v50, %v139_v47 }
  0x24   :  { %108 = vst.msk [vmem:[#allocation9 + $0x8] ss:$4 sm:$0x3] %vm413_vm0, %v101_v44  ;;  %v128_v59 = vadd.f32 %v126_v53, %v120_v51  ;;  %v170_v61 = vld [vmem:[#allocation2 + $0x2] ss:$4 sm:$0x3] }
  0x25   :  { %v152_v62 = vld [vmem:[#allocation6 + $0xa] ss:$4 sm:$0x3]  ;;  %v135_v63 = vadd.f32 %v133_v49, %v127_v56  ;;  %v156_v0 = vstv %s418_s6  ;;  %v155_v1 = vld [vmem:[#allocation2 + $0x8] ss:$4 sm:$0x3] }
  0x26   :  { %v163_v2 = vld [vmem:[#allocation2 + $0x9] ss:$4 sm:$0x3]  ;;  %v136_v3 = vadd.f32 %v134_v54, %v128_v59  ;;  %v157_v4 = vmul.f32 %v156_v0, %v154_v52  ;;  %v164_v5 = vstv %s421_s7  ;;  %v178_v6 = vld [vmem:[#allocation2 + $0x3] ss:$4 sm:$0x3]  ;;  %v158_v7 = vmul.f32 %v156_v0, %v155_v1 }
  0x27   :  { %v171_v8 = vld [vmem:[#allocation2 + $0xa] ss:$4 sm:$0x3]  ;;  %v143_v9 = vadd.f32 %v141_v57, %v135_v63  ;;  %v165_v10 = vmul.f32 %v164_v5, %v162_v55  ;;  %v172_v11 = vstv %s424_s8  ;;  %v166_v12 = vmul.f32 %v164_v5, %v163_v2  ;;  %v179_v13 = vld [vmem:[#allocation2 + $0xb] ss:$4 sm:$0x3] }
  0x28   :  { %s435_s10 = sld [smem:[#allocation8 + $0xc]]  ;;  %v144_v14 = vadd.f32 %v142_v60, %v136_v3  ;;  %v159_v15 = vadd.f32 %v157_v4, %v150_v58  ;;  %v173_v16 = vmul.f32 %v172_v11, %v170_v61  ;;  %v160_v17 = vadd.f32 %v158_v7, %v152_v62  ;;  %v190_v24 = vld [vmem:[#allocation6 + $0x3] ss:$4 sm:$0x3] }
  0x29   :  { %s262_s11 = sld [smem:[#allocation8 + $0xd]]  ;;  %146 = vst.msk [vmem:[#allocation9 + $0x1] ss:$4 sm:$0x3] %vm413_vm0, %v143_v9  ;;  %v180_v18 = vstv %s430_s9  ;;  %v174_v19 = vmul.f32 %v172_v11, %v171_v8 }
  0x2a   :  { %148 = vst.msk [vmem:[#allocation9 + $0x9] ss:$4 sm:$0x3] %vm413_vm0, %v144_v14  ;;  %v167_v20 = vadd.f32 %v165_v10, %v159_v15  ;;  %v181_v21 = vmul.f32 %v180_v18, %v178_v6  ;;  %v168_v22 = vadd.f32 %v166_v12, %v160_v17  ;;  %v182_v23 = vmul.f32 %v180_v18, %v179_v13  ;;  %s263_s12 = sld [smem:[#allocation8 + $0xe]] }
  0x2b   :  { %v194_v25 = vld [vmem:[#allocation2] ss:$4 sm:$0x3]  ;;  %s264_s13 = sld [smem:[#allocation8 + $0xf]] }
  0x2c   :  { %v175_v26 = vadd.f32 %v173_v16, %v167_v20  ;;  %v176_v27 = vadd.f32 %v174_v19, %v168_v22  ;;  %v202_v28 = vld [vmem:[#allocation2 + $0x1] ss:$4 sm:$0x3]  ;;  %v210_v29 = vld [vmem:[#allocation2 + $0x2] ss:$4 sm:$0x3] }
  0x2d   :  { %v195_v31 = vld [vmem:[#allocation2 + $0x8] ss:$4 sm:$0x3]  ;;  %v203_v32 = vld [vmem:[#allocation2 + $0x9] ss:$4 sm:$0x3] }
  0x2e   :  { %v196_v30 = vstv %s435_s10  ;;  %v183_v33 = vadd.f32 %v181_v21, %v175_v26  ;;  %v184_v34 = vadd.f32 %v182_v23, %v176_v27  ;;  %v192_v37 = vld [vmem:[#allocation6 + $0xb] ss:$4 sm:$0x3]  ;;  %v211_v39 = vld [vmem:[#allocation2 + $0xa] ss:$4 sm:$0x3] }
  0x2f   :  { %v197_v35 = vmul.f32 %v196_v30, %v194_v25  ;;  %v204_v36 = vstv %s262_s11  ;;  %v218_v41 = vld [vmem:[#allocation2 + $0x3] ss:$4 sm:$0x3]  ;;  %v198_v42 = vmul.f32 %v196_v30, %v195_v31  ;;  %v219_v46 = vld [vmem:[#allocation2 + $0xb] ss:$4 sm:$0x3] }
  0x30   :  { %v205_v40 = vmul.f32 %v204_v36, %v202_v28  ;;  %v206_v43 = vmul.f32 %v204_v36, %v203_v32  ;;  %186 = vst.msk [vmem:[#allocation9 + $0x2] ss:$4 sm:$0x3] %vm413_vm0, %v183_v33  ;;  %v212_v45 = vstv %s263_s12 }
  0x31   :  { %v199_v44 = vadd.f32 %v197_v35, %v190_v24  ;;  %188 = vst.msk [vmem:[#allocation9 + $0xa] ss:$4 sm:$0x3] %vm413_vm0, %v184_v34  ;;  %v213_v47 = vmul.f32 %v212_v45, %v210_v29  ;;  %v220_v48 = vstv %s264_s13  ;;  %v200_v49 = vadd.f32 %v198_v42, %v192_v37 }
  0x32   :  { %v214_v50 = vmul.f32 %v212_v45, %v211_v39  ;;  %v221_v52 = vmul.f32 %v220_v48, %v218_v41  ;;  %v222_v54 = vmul.f32 %v220_v48, %v219_v46 }
  0x33   :  { %v207_v51 = vadd.f32 %v205_v40, %v199_v44  ;;  %v208_v53 = vadd.f32 %v206_v43, %v200_v49 }
  0x35   :  { %v215_v55 = vadd.f32 %v213_v47, %v207_v51  ;;  %v216_v56 = vadd.f32 %v214_v50, %v208_v53 }
  0x37   :  { %v223_v57 = vadd.f32 %v221_v52, %v215_v55  ;;  %v224_v58 = vadd.f32 %v222_v54, %v216_v56 }
  0x39   :  { %226 = vst.msk [vmem:[#allocation9 + $0x3] ss:$4 sm:$0x3] %vm413_vm0, %v223_v57 }
  0x3a   :  { %228 = vst.msk [vmem:[#allocation9 + $0xb] ss:$4 sm:$0x3] %vm413_vm0, %v224_v58 }
  0x3b   :  { %241 = dma.vmem_to_hbm [thread:$0]  %s234_s15, 256, %s236_s18, [#allocation4], %s364_s20, %s364_s20, %s365_s21  }
  0x3c   :  { %361 = dma.done.wait [#allocation4], 256  }
  0x3d   :  { %362 = vsyncadd [#allocation4], 4294967040 }
  0x3e   :  { %246 = vsyncpa [#allocation3], 1 }
  0x3f   :  { %247 = vsyncpa [#allocation7], 1 }
  0x40   :  { %248 = vsyncpa [#allocation4], 1 }
  0x41   :  { %249 = vsyncpa [#allocation5], 1 }

</bundles_post_ra>
